<compile_context>
chip_gen: v7x
topology: tpu7x:2x2x1
jax: 0.10.0
libtpu: 0.0.40
codegen_flags: <defaults>
</compile_context>

<pallas_src>
import jax
import jax.numpy as jnp
from jax.experimental import pallas as pl
from jax.experimental.pallas import tpu as pltpu


def _mish_kernel(x_ref, o_ref):
    x = x_ref[...].astype(jnp.float32)
    # mish(x) = x * tanh(softplus(x)) = x * e*(e+2) / (e*(e+2) + 2), e = exp(x).
    # Clamp the exp argument so e never overflows; for x > 20 the exact value
    # equals x to f32 precision, selected by the where below.
    e = jnp.exp(jnp.minimum(x, 20.0))
    t = e * (e + 2.0)
    y = x * (t / (t + 2.0))
    y = jnp.where(x > 20.0, x, y)
    o_ref[...] = y.astype(o_ref.dtype)


def mish(x, *, tile_rows=4096):
    """Applies Mish elementwise. Accepts any shape; f32 internal compute."""
    orig_shape = x.shape
    orig_dtype = x.dtype
    n = x.size
    lane = 128

    ragged = (n % lane) != 0
    if ragged:
        # Uncommon path: pad flat length to a multiple of 8*128 (keeps rows a
        # multiple of 8). mish(0) == 0 so zero-padding is harmless.
        block = 8 * lane
        n_pad = ((n + block - 1) // block) * block
        x_flat = jnp.pad(jnp.reshape(x, (-1,)), (0, n_pad - n))
    else:
        # Common NCHW path: pure metadata reshape, no extra HBM traffic.
        n_pad = n
        x_flat = jnp.reshape(x, (-1,))

    rows = n_pad // lane
    x2d = jnp.reshape(x_flat, (rows, lane))

    # Block rows: whole array when it is small, otherwise a 2 MiB (f32) tile.
    # tile_rows is a multiple of 8; the last (possibly partial) block is
    # handled by Pallas with masked writes.
    tr = rows if rows <= tile_rows else tile_rows
    grid = (pl.cdiv(rows, tr),)

    out2d = pl.pallas_call(
        _mish_kernel,
        out_shape=jax.ShapeDtypeStruct((rows, lane), orig_dtype),
        grid_spec=pltpu.PrefetchScalarGridSpec(
            num_scalar_prefetch=0,
            grid=grid,
            in_specs=[pl.BlockSpec((tr, lane), lambda i: (i, 0))],
            out_specs=pl.BlockSpec((tr, lane), lambda i: (i, 0)),
        ),
        compiler_params=pltpu.CompilerParams(
            dimension_semantics=("parallel",),
            # Actual usage at 2 MiB blocks is ~8-16 MiB; raise the scoped limit
            # so v5e's 16 MiB default does not choke (headroom on v7x's 64 MiB).
            vmem_limit_bytes=48 * 1024 * 1024,
        ),
    )(x2d)

    if ragged:
        out_flat = jnp.reshape(out2d, (-1,))[:n]
        return jnp.reshape(out_flat, orig_shape)
    return jnp.reshape(out2d, orig_shape)


def _mish_ref(x):
    xf = x.astype(jnp.float32)
    sp = jnp.maximum(xf, 0.0) + jnp.log1p(jnp.exp(-jnp.abs(xf)))
    return (xf * jnp.tanh(sp)).astype(x.dtype)


if __name__ == "__main__":
    key = jax.random.PRNGKey(0)

    # NCHW input, small shape: batch=2, channels=4, spatial=16x16.
    x = jax.random.normal(key, (2, 4, 16, 16), dtype=jnp.float32) * 3.0
    y = jax.block_until_ready(mish(x))
    y_ref = _mish_ref(x)
    assert y.shape == x.shape and y.dtype == x.dtype
    assert jnp.max(jnp.abs(y - y_ref)) < 1e-4

    # Also exercise the ragged (non-multiple-of-128) path.
    x2 = jax.random.normal(jax.random.PRNGKey(1), (2, 3, 50), dtype=jnp.float32) * 3.0
    y2 = jax.block_until_ready(mish(x2))
    y2_ref = _mish_ref(x2)
    assert y2.shape == x2.shape and y2.dtype == x2.dtype
    assert jnp.max(jnp.abs(y2 - y2_ref)) < 1e-4

    print("KERNEL_OK")
</pallas_src>

<mosaic_0001>
module attributes {stable_mosaic.version = 11 : i64} {
  func.func @_mish_kernel(%arg0: i32, %arg1: memref<16x128xf32, #tpu.memory_space<vmem>>, %arg2: memref<16x128xf32, #tpu.memory_space<vmem>>) attributes {dimension_semantics = [#tpu.dimension_semantics<parallel>], iteration_bounds = array<i64: 1>, scalar_prefetch = 0 : i64, scratch_operands = 0 : i64, tpu.core_type = #tpu.core_type<tc>, window_params = [{transform_indices = @transform_0, window_bounds = array<i64: 16, 128>}, {transform_indices = @transform_1, window_bounds = array<i64: 16, 128>}]} {
    %c0 = arith.constant 0 : index
    %c0_0 = arith.constant 0 : index
    %0 = vector.load %arg1[%c0, %c0_0] : memref<16x128xf32, #tpu.memory_space<vmem>>, vector<16x128xf32>
    %cst = arith.constant 2.000000e+01 : f32
    %1 = vector.broadcast %cst : f32 to vector<16x128xf32>
    %2 = arith.minimumf %0, %1 : vector<16x128xf32>
    %3 = math.exp %2 : vector<16x128xf32>
    %cst_1 = arith.constant 2.000000e+00 : f32
    %4 = vector.broadcast %cst_1 : f32 to vector<16x128xf32>
    %5 = arith.addf %3, %4 : vector<16x128xf32>
    %6 = arith.mulf %3, %5 : vector<16x128xf32>
    %cst_2 = arith.constant 2.000000e+00 : f32
    %7 = vector.broadcast %cst_2 : f32 to vector<16x128xf32>
    %8 = arith.addf %6, %7 : vector<16x128xf32>
    %9 = arith.divf %6, %8 : vector<16x128xf32>
    %10 = arith.mulf %0, %9 : vector<16x128xf32>
    %cst_3 = arith.constant 2.000000e+01 : f32
    %11 = vector.broadcast %cst_3 : f32 to vector<16x128xf32>
    %12 = arith.cmpf ogt, %0, %11 : vector<16x128xf32>
    %13 = arith.select %12, %0, %10 : vector<16x128xi1>, vector<16x128xf32>
    %c0_4 = arith.constant 0 : index
    %c0_5 = arith.constant 0 : index
    %14 = vector.load %arg2[%c0_4, %c0_5] : memref<16x128xf32, #tpu.memory_space<vmem>>, vector<16x128xf32>
    tpu.vector_store %arg2[%c0_4, %c0_5], %13 {strides = array<i32>} : memref<16x128xf32, #tpu.memory_space<vmem>>, vector<16x128xf32>,
    return
  }
  func.func @transform_0(%arg0: i32) -> (i32, i32) {
    %c0_i32 = arith.constant 0 : i32
    %c0_i32_0 = arith.constant 0 : i32
    return %arg0, %c0_i32 : i32, i32
  }
  func.func @transform_1(%arg0: i32) -> (i32, i32) {
    %c0_i32 = arith.constant 0 : i32
    %c0_i32_0 = arith.constant 0 : i32
    return %arg0, %c0_i32 : i32, i32
  }
}

</mosaic_0001>

<bundles_post_ra>
// kernel: tpu_custom_call.1
= control target key start
LH: loop header
LB: loop body
LE: loop exit
PB: predicated region body
PF: predicated region fallthrough
CT: control target
= control target key end

     0   :  { %6 = vsyncpa [#allocation3], 0  ;;  %s170_s0 = inlined_call_operand.hbm [shape: f32[16,128], index: 0, kind: input, shape index: {}]   ;;  %s171_s1 = inlined_call_operand.hbm [shape: f32[16,128], index: 1, kind: output, shape index: {}]  }
   0x1   :  { %7 = vsyncpa [#allocation4], 0  ;;  %s126_s6 = smov [#allocation2]   ;;  %s78_s10 = scalar_lea.hbm %s170_s0, 256 }
   0x2   :  { %s13_s7 = sshll.u32 %s126_s6, 4  ;;  %p79_p0 = scmp.ne.s32.totalorder %s170_s0, %s78_s10  ;;  %s14_s7 = int_to_ptr.vmem [resolvable:$true] %s13_s7 }
   0x3   :  { %p82_p1 = scmp.lt.u32.totalorder %s78_s10, %s170_s0 }
   0x5   :  { %p84_p2 = pnand %p82_p1, %p79_p0 }
   0x7   :  { %87 = shalt.err (!%p84_p2)
}
   0x8   :  { %s88_s15 = scalar_lea.vmem %s14_s7, 256  ;;  %p93_p4 = scmp.lt.s32.totalorder %s14_s7, %s14_s7 }
   0x9   :  { %p89_p3 = scmp.ne.s32.totalorder %s14_s7, %s88_s15  ;;  %p94_p5 = scmp.lt.s32.totalorder %s88_s15, %s88_s15 }
   0xb   :  { %p95_p6 = por %p94_p5, %p93_p4 }
   0xd   :  { %p96_p7 = pnand %p95_p6, %p89_p3 }
   0xf   :  { %99 = shalt.err (!%p96_p7)
}
  0x10   :  { %s127_s16 = smov 128   ;;  %s128_s17 = smov 8  }
  0x11   :  { %19 = dma.hbm_to_vmem [thread:$0]  %s170_s0, 256, %s14_s7, [#allocation3], %s127_s16, %s127_s16, %s128_s17  }
  0x12   :  { %122 = dma.done.wait [#allocation3], 256  }
  0x13   :  { %123 = vsyncadd [#allocation3], 4294967040  ;;  %v23_v0 = vld [vmem:[#allocation2] sm:$0xff]  ;;  %v24_v1 = vld [vmem:[#allocation2 + $0x8] sm:$0xff]  ;;  %s129_s0 = smov [#allocation5]  }
  0x14   :  { %v25_v2 = vmin.f32 %v23_v0, 20.0  ;;  %v26_v3 = vmin.f32 %v24_v1, 20.0  ;;  %vm43_vm0 = vcmp.gt.f32.partialorder %v23_v0, 20.0  ;;  %s54_s20 = sshll.u32 %s129_s0, 4  ;;  %vm44_vm1 = vcmp.gt.f32.partialorder %v24_v1, 20.0  ;;  %s55_s20 = int_to_ptr.vmem [resolvable:$true] %s54_s20 }
  0x15   :  { %s100_s21 = scalar_lea.vmem %s55_s20, 256  ;;  %p105_p9 = scmp.lt.s32.totalorder %s55_s20, %s55_s20 }
  0x16   :  { %v27_v4 = vmul.f32 1.442695, %v25_v2  ;;  %v29_v5 = vmul.f32 1.442695, %v26_v3  ;;  %p101_p8 = scmp.ne.s32.totalorder %s55_s20, %s100_s21  ;;  %p106_p10 = scmp.lt.s32.totalorder %s100_s21, %s100_s21 }
  0x18   :  { %70 = vpow2.f32 %v27_v4  ;;  %p107_p11 = por %p106_p10, %p105_p9 }
  0x19   :  { %72 = vpow2.f32 %v29_v5 }
  0x1a   :  { %p108_p12 = pnand %p107_p11, %p101_p8 }
  0x22   :  { %v71_v6 = vpop.eup %70 }
  0x23   :  { %v73_v7 = vpop.eup %72  ;;  %v31_v8 = vadd.f32 2.0, %v71_v6 }
  0x24   :  { %v32_v9 = vadd.f32 2.0, %v73_v7 }
  0x25   :  { %v33_v10 = vmul.f32 %v71_v6, %v31_v8 }
  0x26   :  { %v34_v11 = vmul.f32 %v73_v7, %v32_v9 }
  0x27   :  { %v35_v12 = vadd.f32 2.0, %v33_v10 }
  0x28   :  { %v36_v13 = vadd.f32 2.0, %v34_v11 }
  0x29   :  { %74 = vrcp.f32 %v35_v12 }
  0x2a   :  { %76 = vrcp.f32 %v36_v13 }
  0x33   :  { %v75_v14 = vpop.eup %74 }
  0x34   :  { %v77_v15 = vpop.eup %76  ;;  %v38_v16 = vmul.f32 %v75_v14, %v33_v10 }
  0x35   :  { %v40_v17 = vmul.f32 %v77_v15, %v34_v11 }
  0x36   :  { %v41_v18 = vmul.f32 %v38_v16, %v23_v0 }
  0x37   :  { %v42_v19 = vmul.f32 %v40_v17, %v24_v1 }
  0x38   :  { %v45_v20 = vsel %vm43_vm0, %v23_v0, %v41_v18 }
  0x39   :  { %47 = vst [vmem:[#allocation5] sm:$0xff] %v45_v20  ;;  %v46_v21 = vsel %vm44_vm1, %v24_v1, %v42_v19 }
  0x3a   :  { %48 = vst [vmem:[#allocation5 + $0x8] sm:$0xff] %v46_v21 }
  0x3b   :  { %111 = shalt.err (!%p108_p12)
}
  0x3c   :  { %s112_s24 = scalar_lea.hbm %s171_s1, 256 }
  0x3d   :  { %p113_p13 = scmp.ne.s32.totalorder %s171_s1, %s112_s24  ;;  %p116_p0 = scmp.lt.u32.totalorder %s112_s24, %s171_s1 }
  0x3f   :  { %p118_p1 = pnand %p116_p0, %p113_p13 }
  0x41   :  { %121 = shalt.err (!%p118_p1)
}
  0x42   :  { %60 = dma.vmem_to_hbm [thread:$0]  %s55_s20, 256, %s171_s1, [#allocation4], %s127_s16, %s127_s16, %s128_s17  }
  0x43   :  { %124 = dma.done.wait [#allocation4], 256  }
  0x44   :  { %125 = vsyncadd [#allocation4], 4294967040 }
  0x45   :  { %64 = vsyncpa [#allocation3], 1 }
  0x46   :  { %65 = vsyncpa [#allocation4], 1 }

</bundles_post_ra>
